<compile_context>
chip_gen: v6e
topology: v6e:2x2x1
jax: 0.10.0
libtpu: 0.0.40
codegen_flags: <defaults>
</compile_context>

<pallas_src>
import functools
import math

import jax
import jax.numpy as jnp
from jax.experimental import pallas as pl
from jax.experimental.pallas import tpu as pltpu

D_MODEL = 32               # d_model of the PyTorch module (default)
NUM_HEADS = 1              # single head -> d_head == d_model
LANES = 128                # TPU vreg lane width
BT_TARGET = 256            # batch elements per grid step (sweep 128-512 per chip)
VMEM_LIMIT_BYTES = 32 * 1024 * 1024


# ---------------------------------------------------------------------------
# Kernel bodies
# ---------------------------------------------------------------------------
def _attention(q_p, k_p, v_p, *, bt, sq, sk, d, pack):
    """q_p/k_p/v_p: packed (bt*s//pack, pack*d) f32 projections -> packed context."""
    scale = 1.0 / math.sqrt(d)
    q3 = q_p.reshape(bt, sq, d)
    k3 = k_p.reshape(bt, sk, d)
    v3 = v_p.reshape(bt, sk, d)
    # Both contractions on the MXU (review: keep the D / Sk reductions off the XLU).
    s = jnp.einsum("bqd,bkd->bqk", q3, k3, preferred_element_type=jnp.float32) * scale
    s = s - jnp.max(s, axis=-1, keepdims=True)
    p = jnp.exp(s)                                                        # EUP
    inv = pl.reciprocal(jnp.sum(p, axis=-1, keepdims=True), approx=True)  # EUP
    ctx = jnp.einsum("bqk,bkd->bqd", p * inv, v3,
                     preferred_element_type=jnp.float32)
    # Back to the lane-dense packed layout for a dense, unmasked output store.
    return ctx.reshape(bt * sq // pack, pack * d)


def _mha_kernel(q_ref, k_ref, v_ref, w_ref, b_ref, out_ref, *, bt, sq, sk, d, pack):
    """General (cross-attention) path.  w_ref = [Wq' | Wk' | Wv'] fused weight slab."""
    pw = pack * d
    q_p = jnp.dot(q_ref[...], w_ref[:, 0 * pw:1 * pw],
                  preferred_element_type=jnp.float32) + b_ref[:, 0 * pw:1 * pw]
    k_p = jnp.dot(k_ref[...], w_ref[:, 1 * pw:2 * pw],
                  preferred_element_type=jnp.float32) + b_ref[:, 1 * pw:2 * pw]
    v_p = jnp.dot(v_ref[...], w_ref[:, 2 * pw:3 * pw],
                  preferred_element_type=jnp.float32) + b_ref[:, 2 * pw:3 * pw]
    ctx = _attention(q_p, k_p, v_p, bt=bt, sq=sq, sk=sk, d=d, pack=pack)
    out_ref[...] = ctx.astype(out_ref.dtype)


def _mha_self_kernel(x_ref, w_ref, b_ref, out_ref, *, bt, sq, d, pack):
    """Fused-QKV path for self-attention (query is key is value): one DMA, one matmul."""
    pw = pack * d
    proj = jnp.dot(x_ref[...], w_ref[...],
                   preferred_element_type=jnp.float32) + b_ref[...]
    ctx = _attention(proj[:, 0 * pw:1 * pw], proj[:, 1 * pw:2 * pw],
                     proj[:, 2 * pw:3 * pw], bt=bt, sq=sq, sk=sq, d=d, pack=pack)
    out_ref[...] = ctx.astype(out_ref.dtype)


# ---------------------------------------------------------------------------
# One-time parameter preparation (hoisted out of the hot wrapper per review)
# ---------------------------------------------------------------------------
def prepare_params(params, dtype=jnp.float32):
    """Build fused [Wq^T | Wk^T | Wv^T] weight slabs and tiled bias rows.

    For pack = 128 // d the per-projection weight is the pack-times block-diagonal
    replication of W^T, so a packed (M, 128) row slab (4 consecutive d=32 rows per
    128-lane row) is projected by one lane-dense (M,128)@(128,128) matmul.
    A plain pack=1 variant is kept as a fallback layout.
    """
    d = params["wq"].shape[0]
    packs = [1]
    if d < LANES and LANES % d == 0:
        packs.append(LANES // d)
    weights = {}
    for pack in packs:
        eye = jnp.eye(pack, dtype=dtype)
        w = jnp.concatenate(
            [jnp.kron(eye, params[n].T.astype(dtype)) for n in ("wq", "wk", "wv")],
            axis=1)                                               # (pack*d, 3*pack*d)
        b = jnp.concatenate(
            [jnp.tile(params[n].astype(dtype), pack) for n in ("bq", "bk", "bv")]
        ).reshape(1, 3 * pack * d)
        weights[pack] = (w, b)
    return {"d": d, "weights": weights}


# ---------------------------------------------------------------------------
# Wrapper
# ---------------------------------------------------------------------------
def multi_head_attention(query, key, value, prep, *, block_batch=BT_TARGET,
                         vmem_limit_bytes=VMEM_LIMIT_BYTES):
    """query: (B, Sq, D), key/value: (B, Sk, D) -> context (B, Sq, D).  num_heads = 1."""
    b, sq, d = query.shape
    _, sk, _ = key.shape
    assert key.shape == (b, sk, d) and value.shape == (b, sk, d)
    assert d == prep["d"]
    self_attn = (query is key) and (key is value)

    def run(pack):
        w, bias = prep["weights"][pack]
        pw = pack * d                    # packed lane width (128 on the fast path)
        rq = sq // pack                  # packed rows per batch element (query side)
        rk = sk // pack

        # ---- batch-tile sizing (per-chip review feedback) ----
        align = 1
        for r in (rq, rk):
            align = math.lcm(align, 8 // math.gcd(r, 8))   # 8-sublane divisibility
        bt = min(block_batch, b)
        if bt < b:
            bt = max(align, (bt // align) * align)
        elif b > align:
            # A single grid step leaves nothing for the pipeline to overlap and no
            # batch axis for v7x megacore sharding: split the batch into >= 2 steps.
            half = ((b + 1) // 2 + align - 1) // align * align
            if half < b:
                bt = half
        grid_b = pl.cdiv(b, bt)
        # NOTE: if b % bt != 0 the last step computes on Pallas-padded garbage rows;
        # the padded writeback is masked so the visible output stays correct.

        # Free, bit-identical lane packing of the row-major inputs.
        q2 = query.reshape(b * rq, pw)
        k2 = key.reshape(b * rk, pw)
        v2 = value.reshape(b * rk, pw)

        w_spec = pl.BlockSpec(w.shape, lambda i: (0, 0))      # VMEM-resident weights
        b_spec = pl.BlockSpec(bias.shape, lambda i: (0, 0))
        q_spec = pl.BlockSpec((bt * rq, pw), lambda i: (i, 0))
        kv_spec = pl.BlockSpec((bt * rk, pw), lambda i: (i, 0))
        out_spec = pl.BlockSpec((bt * rq, pw), lambda i: (i, 0))
        out_shape = jax.ShapeDtypeStruct((b * rq, pw), query.dtype)
        cparams = pltpu.CompilerParams(
            dimension_semantics=("parallel",),   # megacore on v7x; no-op on v5e/v6e
            vmem_limit_bytes=vmem_limit_bytes)

        if self_attn:
            kernel = functools.partial(_mha_self_kernel, bt=bt, sq=sq, d=d, pack=pack)
            out = pl.pallas_call(
                kernel, out_shape=out_shape, grid=(grid_b,),
                in_specs=[q_spec, w_spec, b_spec], out_specs=out_spec,
                compiler_params=cparams,
            )(q2, w, bias)
        else:
            kernel = functools.partial(_mha_kernel, bt=bt, sq=sq, sk=sk, d=d, pack=pack)
            out = pl.pallas_call(
                kernel, out_shape=out_shape, grid=(grid_b,),
                in_specs=[q_spec, kv_spec, kv_spec, w_spec, b_spec],
                out_specs=out_spec, compiler_params=cparams,
            )(q2, k2, v2, w, bias)
        return out.reshape(b, sq, d)

    best_pack = LANES // d if (d < LANES and LANES % d == 0) else 1
    if (best_pack > 1 and sq % best_pack == 0 and sk % best_pack == 0
            and best_pack in prep["weights"]):
        try:
            return jax.block_until_ready(run(best_pack))
        except Exception:  # noqa: BLE001
            # TODO(synk): lane-packed relayout rejected by this Mosaic build; fall back
            # to the d_model-wide layout (correct, but ~4x lower lane occupancy).
            pass
    return run(1)


# ---------------------------------------------------------------------------
# Deterministic parameter init (mirrors nn.Linear(d_model, d_model) default init)
# ---------------------------------------------------------------------------
def init_params(key, d=D_MODEL):
    ks = jax.random.split(key, 6)
    bound = 1.0 / math.sqrt(d)
    u = lambda k, shape: jax.random.uniform(k, shape, jnp.float32, -bound, bound)
    return {
        "wq": u(ks[0], (d, d)), "bq": u(ks[1], (d,)),
        "wk": u(ks[2], (d, d)), "bk": u(ks[3], (d,)),
        "wv": u(ks[4], (d, d)), "bv": u(ks[5], (d,)),
    }


# ---------------------------------------------------------------------------
# Pure-JAX reference (correctness check only)
# ---------------------------------------------------------------------------
def _reference(query, key, value, params):
    d_head = query.shape[-1] // NUM_HEADS
    q = query @ params["wq"].T + params["bq"]
    k = key @ params["wk"].T + params["bk"]
    v = value @ params["wv"].T + params["bv"]
    scores = jnp.einsum("bqd,bkd->bqk", q, k) / math.sqrt(d_head)
    attn = jax.nn.softmax(scores, axis=-1)
    return jnp.einsum("bqk,bkd->bqd", attn, v)


if __name__ == "__main__":
    root = jax.random.PRNGKey(0)
    kq, kk, kv, kp, kx, kb1, kb2, kb3 = jax.random.split(root, 8)

    D = D_MODEL
    params = init_params(kp, D)
    prep = prepare_params(params, dtype=jnp.float32)   # one-time weight packing

    # Tolerance: MXU matmuls of f32 operands run at TPU default (bf16-pass) precision
    # and the softmax denominator uses the EUP approximate reciprocal.
    tol = dict(atol=1e-2, rtol=1e-2)

    # 1) cross-attention at the small module shapes (B=2, Sq=Sk=8, D=32).
    B, SQ, SK = 2, 8, 8
    query = jax.random.normal(kq, (B, SQ, D), jnp.float32)
    key_t = jax.random.normal(kk, (B, SK, D), jnp.float32)
    value = jax.random.normal(kv, (B, SK, D), jnp.float32)
    out = jax.block_until_ready(multi_head_attention(query, key_t, value, prep))
    assert out.shape == (B, SQ, D)
    assert jnp.allclose(out, _reference(query, key_t, value, params), **tol), \
        "cross-attention mismatch vs reference"

    # 2) fused-QKV self-attention fast path (query is key is value).
    x = jax.random.normal(kx, (B, SQ, D), jnp.float32)
    out_self = jax.block_until_ready(multi_head_attention(x, x, x, prep))
    assert jnp.allclose(out_self, _reference(x, x, x, params), **tol), \
        "self-attention mismatch vs reference"

    # 3) batch large enough to exercise the multi-step (pipelined / megacore) grid.
    B2 = 48
    q_b = jax.random.normal(kb1, (B2, SQ, D), jnp.float32)
    k_b = jax.random.normal(kb2, (B2, SK, D), jnp.float32)
    v_b = jax.random.normal(kb3, (B2, SK, D), jnp.float32)
    out_b = jax.block_until_ready(multi_head_attention(q_b, k_b, v_b, prep))
    assert jnp.allclose(out_b, _reference(q_b, k_b, v_b, params), **tol), \
        "tiled-batch mismatch vs reference"

    print("KERNEL_OK")
</pallas_src>

<mosaic_0001>
module attributes {stable_mosaic.version = 11 : i64} {
  func.func @_mha_kernel(%arg0: i32, %arg1: memref<4x128xf32, #tpu.memory_space<vmem>>, %arg2: memref<4x128xf32, #tpu.memory_space<vmem>>, %arg3: memref<4x128xf32, #tpu.memory_space<vmem>>, %arg4: memref<128x384xf32, #tpu.memory_space<vmem>>, %arg5: memref<1x384xf32, #tpu.memory_space<vmem>>, %arg6: memref<4x128xf32, #tpu.memory_space<vmem>>) attributes {dimension_semantics = [#tpu.dimension_semantics<parallel>], iteration_bounds = array<i64: 1>, scalar_prefetch = 0 : i64, scratch_operands = 0 : i64, tpu.core_type = #tpu.core_type<tc>, window_params = [{transform_indices = @transform_0, window_bounds = array<i64: 4, 128>}, {transform_indices = @transform_1, window_bounds = array<i64: 4, 128>}, {transform_indices = @transform_2, window_bounds = array<i64: 4, 128>}, {pipeline_mode = #tpu.pipeline_mode<synchronous>, transform_indices = @transform_3, window_bounds = array<i64: 128, 384>}, {pipeline_mode = #tpu.pipeline_mode<synchronous>, transform_indices = @transform_4, window_bounds = array<i64: 1, 384>}, {transform_indices = @transform_5, window_bounds = array<i64: 4, 128>}]} {
    %c0 = arith.constant 0 : index
    %c0_0 = arith.constant 0 : index
    %0 = vector.load %arg1[%c0, %c0_0] : memref<4x128xf32, #tpu.memory_space<vmem>>, vector<4x128xf32>
    %c0_1 = arith.constant 0 : index
    %c0_2 = arith.constant 0 : index
    %1 = vector.load %arg4[%c0_1, %c0_2] : memref<128x384xf32, #tpu.memory_space<vmem>>, vector<128x128xf32>
    %cst = arith.constant dense<0.000000e+00> : vector<4x128xf32>
    %2 = tpu.matmul %0, %1, %cst {dimension_numbers = #tpu.dot_dimension_numbers<[1], [0], [0], [1], [0, 0, 1, 1], [], []>} : vector<4x128xf32>, vector<128x128xf32>, vector<4x128xf32> -> vector<4x128xf32>
    %c0_3 = arith.constant 0 : index
    %c0_4 = arith.constant 0 : index
    %3 = vector.load %arg5[%c0_3, %c0_4] : memref<1x384xf32, #tpu.memory_space<vmem>>, vector<1x128xf32>
    %4 = vector.broadcast %3 : vector<1x128xf32> to vector<4x128xf32>
    %5 = arith.addf %2, %4 : vector<4x128xf32>
    %c0_5 = arith.constant 0 : index
    %c0_6 = arith.constant 0 : index
    %6 = vector.load %arg2[%c0_5, %c0_6] : memref<4x128xf32, #tpu.memory_space<vmem>>, vector<4x128xf32>
    %c0_7 = arith.constant 0 : index
    %c128 = arith.constant 128 : index
    %7 = vector.load %arg4[%c0_7, %c128] : memref<128x384xf32, #tpu.memory_space<vmem>>, vector<128x128xf32>
    %cst_8 = arith.constant dense<0.000000e+00> : vector<4x128xf32>
    %8 = tpu.matmul %6, %7, %cst_8 {dimension_numbers = #tpu.dot_dimension_numbers<[1], [0], [0], [1], [0, 0, 1, 1], [], []>} : vector<4x128xf32>, vector<128x128xf32>, vector<4x128xf32> -> vector<4x128xf32>
    %c0_9 = arith.constant 0 : index
    %c128_10 = arith.constant 128 : index
    %9 = vector.load %arg5[%c0_9, %c128_10] : memref<1x384xf32, #tpu.memory_space<vmem>>, vector<1x128xf32>
    %10 = vector.broadcast %9 : vector<1x128xf32> to vector<4x128xf32>
    %11 = arith.addf %8, %10 : vector<4x128xf32>
    %c0_11 = arith.constant 0 : index
    %c0_12 = arith.constant 0 : index
    %12 = vector.load %arg3[%c0_11, %c0_12] : memref<4x128xf32, #tpu.memory_space<vmem>>, vector<4x128xf32>
    %c0_13 = arith.constant 0 : index
    %c256 = arith.constant 256 : index
    %13 = vector.load %arg4[%c0_13, %c256] : memref<128x384xf32, #tpu.memory_space<vmem>>, vector<128x128xf32>
    %cst_14 = arith.constant dense<0.000000e+00> : vector<4x128xf32>
    %14 = tpu.matmul %12, %13, %cst_14 {dimension_numbers = #tpu.dot_dimension_numbers<[1], [0], [0], [1], [0, 0, 1, 1], [], []>} : vector<4x128xf32>, vector<128x128xf32>, vector<4x128xf32> -> vector<4x128xf32>
    %c0_15 = arith.constant 0 : index
    %c256_16 = arith.constant 256 : index
    %15 = vector.load %arg5[%c0_15, %c256_16] : memref<1x384xf32, #tpu.memory_space<vmem>>, vector<1x128xf32>
    %16 = vector.broadcast %15 : vector<1x128xf32> to vector<4x128xf32>
    %17 = arith.addf %14, %16 : vector<4x128xf32>
    %18 = vector.shape_cast %5 : vector<4x128xf32> to vector<2x8x32xf32>
    %19 = vector.shape_cast %11 : vector<4x128xf32> to vector<2x8x32xf32>
    %20 = vector.shape_cast %17 : vector<4x128xf32> to vector<2x8x32xf32>
    "tpu.trace_start"() <{level = 10 : i32, message = "bqd,bkd->bqk"}> : () -> ()
    %cst_17 = arith.constant dense<0.000000e+00> : vector<2x8x8xf32>
    %21 = tpu.matmul %18, %19, %cst_17 {dimension_numbers = #tpu.dot_dimension_numbers<[2], [2], [1], [1], [0, 0, 0, 1, 1, 1], [0], [0]>} : vector<2x8x32xf32>, vector<2x8x32xf32>, vector<2x8x8xf32> -> vector<2x8x8xf32>
    "tpu.trace_stop"() : () -> ()
    %cst_18 = arith.constant 0.176776692 : f32
    %22 = vector.broadcast %cst_18 : f32 to vector<2x8x8xf32>
    %23 = arith.mulf %21, %22 : vector<2x8x8xf32>
    %cst_19 = arith.constant dense<0xFF800000> : vector<2x8xf32>
    %24 = vector.multi_reduction <maximumf>, %23, %cst_19 [2] : vector<2x8x8xf32> to vector<2x8xf32>
    %25 = vector.shape_cast %24 : vector<2x8xf32> to vector<2x8x1xf32>
    %26 = vector.broadcast %25 : vector<2x8x1xf32> to vector<2x8x8xf32>
    %27 = arith.subf %23, %26 : vector<2x8x8xf32>
    %28 = math.exp %27 : vector<2x8x8xf32>
    %cst_20 = arith.constant dense<0.000000e+00> : vector<2x8xf32>
    %29 = vector.multi_reduction <add>, %28, %cst_20 [2] : vector<2x8x8xf32> to vector<2x8xf32>
    %30 = vector.shape_cast %29 : vector<2x8xf32> to vector<2x8x1xf32>
    %31 = tpu.reciprocal %30 {approx = true} : vector<2x8x1xf32> -> vector<2x8x1xf32>
    %32 = vector.broadcast %31 : vector<2x8x1xf32> to vector<2x8x8xf32>
    %33 = arith.mulf %28, %32 : vector<2x8x8xf32>
    "tpu.trace_start"() <{level = 10 : i32, message = "bqk,bkd->bqd"}> : () -> ()
    %cst_21 = arith.constant dense<0.000000e+00> : vector<2x8x32xf32>
    %34 = tpu.matmul %33, %20, %cst_21 {dimension_numbers = #tpu.dot_dimension_numbers<[2], [1], [1], [2], [0, 0, 0, 1, 1, 2], [0], [0]>} : vector<2x8x8xf32>, vector<2x8x32xf32>, vector<2x8x32xf32> -> vector<2x8x32xf32>
    "tpu.trace_stop"() : () -> ()
    %35 = vector.shape_cast %34 : vector<2x8x32xf32> to vector<4x128xf32>
    %c0_22 = arith.constant 0 : index
    %c0_23 = arith.constant 0 : index
    %36 = vector.load %arg6[%c0_22, %c0_23] : memref<4x128xf32, #tpu.memory_space<vmem>>, vector<4x128xf32>
    tpu.vector_store %arg6[%c0_22, %c0_23], %35 {strides = array<i32>} : memref<4x128xf32, #tpu.memory_space<vmem>>, vector<4x128xf32>,
    return
  }
  func.func @transform_0(%arg0: i32) -> (i32, i32) {
    %c0_i32 = arith.constant 0 : i32
    %c0_i32_0 = arith.constant 0 : i32
    return %arg0, %c0_i32 : i32, i32
  }
  func.func @transform_1(%arg0: i32) -> (i32, i32) {
    %c0_i32 = arith.constant 0 : i32
    %c0_i32_0 = arith.constant 0 : i32
    return %arg0, %c0_i32 : i32, i32
  }
  func.func @transform_2(%arg0: i32) -> (i32, i32) {
    %c0_i32 = arith.constant 0 : i32
    %c0_i32_0 = arith.constant 0 : i32
    return %arg0, %c0_i32 : i32, i32
  }
  func.func @transform_3(%arg0: i32) -> (i32, i32) {
    %c0_i32 = arith.constant 0 : i32
    %c0_i32_0 = arith.constant 0 : i32
    %c0_i32_1 = arith.constant 0 : i32
    return %c0_i32, %c0_i32_0 : i32, i32
  }
  func.func @transform_4(%arg0: i32) -> (i32, i32) {
    %c0_i32 = arith.constant 0 : i32
    %c0_i32_0 = arith.constant 0 : i32
    %c0_i32_1 = arith.constant 0 : i32
    return %c0_i32, %c0_i32_0 : i32, i32
  }
  func.func @transform_5(%arg0: i32) -> (i32, i32) {
    %c0_i32 = arith.constant 0 : i32
    %c0_i32_0 = arith.constant 0 : i32
    return %arg0, %c0_i32 : i32, i32
  }
}

module attributes {stable_mosaic.version = 11 : i64} {
  func.func @_mha_kernel(%arg0: i32, %arg1: memref<8x32xf32, #tpu.memory_space<vmem>>, %arg2: memref<8x32xf32, #tpu.memory_space<vmem>>, %arg3: memref<8x32xf32, #tpu.memory_space<vmem>>, %arg4: memref<32x96xf32, #tpu.memory_space<vmem>>, %arg5: memref<1x96xf32, #tpu.memory_space<vmem>>, %arg6: memref<8x32xf32, #tpu.memory_space<vmem>>) attributes {dimension_semantics = [#tpu.dimension_semantics<parallel>], iteration_bounds = array<i64: 2>, scalar_prefetch = 0 : i64, scratch_operands = 0 : i64, tpu.core_type = #tpu.core_type<tc>, window_params = [{transform_indices = @transform_0, window_bounds = array<i64: 8, 32>}, {transform_indices = @transform_1, window_bounds = array<i64: 8, 32>}, {transform_indices = @transform_2, window_bounds = array<i64: 8, 32>}, {pipeline_mode = #tpu.pipeline_mode<synchronous>, transform_indices = @transform_3, window_bounds = array<i64: 32, 96>}, {pipeline_mode = #tpu.pipeline_mode<synchronous>, transform_indices = @transform_4, window_bounds = array<i64: 1, 96>}, {transform_indices = @transform_5, window_bounds = array<i64: 8, 32>}]} {
    %c0 = arith.constant 0 : index
    %c0_0 = arith.constant 0 : index
    %0 = vector.load %arg1[%c0, %c0_0] : memref<8x32xf32, #tpu.memory_space<vmem>>, vector<8x32xf32>
    %c0_1 = arith.constant 0 : index
    %c0_2 = arith.constant 0 : index
    %1 = vector.load %arg4[%c0_1, %c0_2] : memref<32x96xf32, #tpu.memory_space<vmem>>, vector<32x32xf32>
    %cst = arith.constant dense<0.000000e+00> : vector<8x32xf32>
    %2 = tpu.matmul %0, %1, %cst {dimension_numbers = #tpu.dot_dimension_numbers<[1], [0], [0], [1], [0, 0, 1, 1], [], []>} : vector<8x32xf32>, vector<32x32xf32>, vector<8x32xf32> -> vector<8x32xf32>
    %c0_3 = arith.constant 0 : index
    %c0_4 = arith.constant 0 : index
    %3 = vector.load %arg5[%c0_3, %c0_4] : memref<1x96xf32, #tpu.memory_space<vmem>>, vector<1x32xf32>
    %4 = vector.broadcast %3 : vector<1x32xf32> to vector<8x32xf32>
    %5 = arith.addf %2, %4 : vector<8x32xf32>
    %c0_5 = arith.constant 0 : index
    %c0_6 = arith.constant 0 : index
    %6 = vector.load %arg2[%c0_5, %c0_6] : memref<8x32xf32, #tpu.memory_space<vmem>>, vector<8x32xf32>
    %c0_7 = arith.constant 0 : index
    %c32 = arith.constant 32 : index
    %7 = vector.load %arg4[%c0_7, %c32] : memref<32x96xf32, #tpu.memory_space<vmem>>, vector<32x32xf32>
    %cst_8 = arith.constant dense<0.000000e+00> : vector<8x32xf32>
    %8 = tpu.matmul %6, %7, %cst_8 {dimension_numbers = #tpu.dot_dimension_numbers<[1], [0], [0], [1], [0, 0, 1, 1], [], []>} : vector<8x32xf32>, vector<32x32xf32>, vector<8x32xf32> -> vector<8x32xf32>
    %c0_9 = arith.constant 0 : index
    %c32_10 = arith.constant 32 : index
    %9 = vector.load %arg5[%c0_9, %c32_10] : memref<1x96xf32, #tpu.memory_space<vmem>>, vector<1x32xf32>
    %10 = vector.broadcast %9 : vector<1x32xf32> to vector<8x32xf32>
    %11 = arith.addf %8, %10 : vector<8x32xf32>
    %c0_11 = arith.constant 0 : index
    %c0_12 = arith.constant 0 : index
    %12 = vector.load %arg3[%c0_11, %c0_12] : memref<8x32xf32, #tpu.memory_space<vmem>>, vector<8x32xf32>
    %c0_13 = arith.constant 0 : index
    %c64 = arith.constant 64 : index
    %13 = vector.load %arg4[%c0_13, %c64] : memref<32x96xf32, #tpu.memory_space<vmem>>, vector<32x32xf32>
    %cst_14 = arith.constant dense<0.000000e+00> : vector<8x32xf32>
    %14 = tpu.matmul %12, %13, %cst_14 {dimension_numbers = #tpu.dot_dimension_numbers<[1], [0], [0], [1], [0, 0, 1, 1], [], []>} : vector<8x32xf32>, vector<32x32xf32>, vector<8x32xf32> -> vector<8x32xf32>
    %c0_15 = arith.constant 0 : index
    %c64_16 = arith.constant 64 : index
    %15 = vector.load %arg5[%c0_15, %c64_16] : memref<1x96xf32, #tpu.memory_space<vmem>>, vector<1x32xf32>
    %16 = vector.broadcast %15 : vector<1x32xf32> to vector<8x32xf32>
    %17 = arith.addf %14, %16 : vector<8x32xf32>
    %18 = vector.shape_cast %5 : vector<8x32xf32> to vector<1x8x32xf32>
    %19 = vector.shape_cast %11 : vector<8x32xf32> to vector<1x8x32xf32>
    %20 = vector.shape_cast %17 : vector<8x32xf32> to vector<1x8x32xf32>
    "tpu.trace_start"() <{level = 10 : i32, message = "bqd,bkd->bqk"}> : () -> ()
    %cst_17 = arith.constant dense<0.000000e+00> : vector<1x8x8xf32>
    %21 = tpu.matmul %18, %19, %cst_17 {dimension_numbers = #tpu.dot_dimension_numbers<[2], [2], [1], [1], [0, 0, 0, 1, 1, 1], [0], [0]>} : vector<1x8x32xf32>, vector<1x8x32xf32>, vector<1x8x8xf32> -> vector<1x8x8xf32>
    "tpu.trace_stop"() : () -> ()
    %cst_18 = arith.constant 0.176776692 : f32
    %22 = vector.broadcast %cst_18 : f32 to vector<1x8x8xf32>
    %23 = arith.mulf %21, %22 : vector<1x8x8xf32>
    %cst_19 = arith.constant dense<0xFF800000> : vector<1x8xf32>
    %24 = vector.multi_reduction <maximumf>, %23, %cst_19 [2] : vector<1x8x8xf32> to vector<1x8xf32>
    %25 = vector.shape_cast %24 : vector<1x8xf32> to vector<1x8x1xf32>
    %26 = vector.broadcast %25 : vector<1x8x1xf32> to vector<1x8x8xf32>
    %27 = arith.subf %23, %26 : vector<1x8x8xf32>
    %28 = math.exp %27 : vector<1x8x8xf32>
    %cst_20 = arith.constant dense<0.000000e+00> : vector<1x8xf32>
    %29 = vector.multi_reduction <add>, %28, %cst_20 [2] : vector<1x8x8xf32> to vector<1x8xf32>
    %30 = vector.shape_cast %29 : vector<1x8xf32> to vector<1x8x1xf32>
    %31 = tpu.reciprocal %30 {approx = true} : vector<1x8x1xf32> -> vector<1x8x1xf32>
    %32 = vector.broadcast %31 : vector<1x8x1xf32> to vector<1x8x8xf32>
    %33 = arith.mulf %28, %32 : vector<1x8x8xf32>
    "tpu.trace_start"() <{level = 10 : i32, message = "bqk,bkd->bqd"}> : () -> ()
    %cst_21 = arith.constant dense<0.000000e+00> : vector<1x8x32xf32>
    %34 = tpu.matmul %33, %20, %cst_21 {dimension_numbers = #tpu.dot_dimension_numbers<[2], [1], [1], [2], [0, 0, 0, 1, 1, 2], [0], [0]>} : vector<1x8x8xf32>, vector<1x8x32xf32>, vector<1x8x32xf32> -> vector<1x8x32xf32>
    "tpu.trace_stop"() : () -> ()
    %35 = vector.shape_cast %34 : vector<1x8x32xf32> to vector<8x32xf32>
    %c0_22 = arith.constant 0 : index
    %c0_23 = arith.constant 0 : index
    %36 = vector.load %arg6[%c0_22, %c0_23] : memref<8x32xf32, #tpu.memory_space<vmem>>, vector<8x32xf32>
    tpu.vector_store %arg6[%c0_22, %c0_23], %35 {strides = array<i32>} : memref<8x32xf32, #tpu.memory_space<vmem>>, vector<8x32xf32>,
    return
  }
  func.func @transform_0(%arg0: i32) -> (i32, i32) {
    %c0_i32 = arith.constant 0 : i32
    %c0_i32_0 = arith.constant 0 : i32
    return %arg0, %c0_i32 : i32, i32
  }
  func.func @transform_1(%arg0: i32) -> (i32, i32) {
    %c0_i32 = arith.constant 0 : i32
    %c0_i32_0 = arith.constant 0 : i32
    return %arg0, %c0_i32 : i32, i32
  }
  func.func @transform_2(%arg0: i32) -> (i32, i32) {
    %c0_i32 = arith.constant 0 : i32
    %c0_i32_0 = arith.constant 0 : i32
    return %arg0, %c0_i32 : i32, i32
  }
  func.func @transform_3(%arg0: i32) -> (i32, i32) {
    %c0_i32 = arith.constant 0 : i32
    %c0_i32_0 = arith.constant 0 : i32
    %c0_i32_1 = arith.constant 0 : i32
    return %c0_i32, %c0_i32_0 : i32, i32
  }
  func.func @transform_4(%arg0: i32) -> (i32, i32) {
    %c0_i32 = arith.constant 0 : i32
    %c0_i32_0 = arith.constant 0 : i32
    %c0_i32_1 = arith.constant 0 : i32
    return %c0_i32, %c0_i32_0 : i32, i32
  }
  func.func @transform_5(%arg0: i32) -> (i32, i32) {
    %c0_i32 = arith.constant 0 : i32
    %c0_i32_0 = arith.constant 0 : i32
    return %arg0, %c0_i32 : i32, i32
  }
}

</mosaic_0001>

<bundles_post_ra>
// kernel: tpu_custom_call.1
= control target key start
LH: loop header
LB: loop body
LE: loop exit
PB: predicated region body
PF: predicated region fallthrough
CT: control target
= control target key end

     0   :  { %s1593_s0 = inlined_call_operand.hbm [shape: f32[16,32], index: 0, kind: input, shape index: {}]   ;;  %s1594_s1 = inlined_call_operand.hbm [shape: f32[16,32], index: 1, kind: input, shape index: {}]   ;;  %s1595_s2 = inlined_call_operand.hbm [shape: f32[16,32], index: 2, kind: input, shape index: {}]   ;;  %s1596_s3 = inlined_call_operand.hbm [shape: f32[32,96], index: 3, kind: input, shape index: {}]   ;;  %s1597_s4 = inlined_call_operand.vmem [shape: f32[1,96], index: 4, kind: input, shape index: {}]   ;;  %s1598_s5 = inlined_call_operand.hbm [shape: f32[16,32], index: 5, kind: output, shape index: {}]  }
   0x1   :  { %1611 = sst [smem:[#allocation20_spill]] %s1594_s1 }
   0x2   :  { %1612 = sst [smem:[#allocation21_spill]] %s1598_s5 }
   0x3   :  { %10 = vsyncpa [#allocation3], 0 }
   0x4   :  { %12 = vsyncpa [#allocation3 + $0x1], 0 }
   0x5   :  { %13 = vsyncpa [#allocation6], 0 }
   0x6   :  { %15 = vsyncpa [#allocation6 + $0x1], 0 }
   0x7   :  { %16 = vsyncpa [#allocation9], 0 }
   0x8   :  { %17 = vsyncpa [#allocation4], 0 }
   0x9   :  { %19 = vsyncpa [#allocation4 + $0x1], 0  ;;  %s1285_s18 = smov 0   ;;  %s1287_s19 = smov 0  }
   0xa   :  { %s1289_s20 = smov 0   ;;  %s1291_s21 = smov 0  }
   0xb LB: > { %1613 = sst [smem:[#allocation15_spill]] %s1230_s18  ;;  %s1306_s22 = sadd.s32 1, %s1242_s21   ;;  %s1242_s21 = sphi %s1291_s21, %s1639_s21   ;;  %s1238_s20 = sphi %s1289_s20, %s1643_s20   ;;  %s1234_s19 = sphi %s1287_s19, %s1642_s19   ;;  %s1230_s18 = sphi %s1285_s18, %s1641_s18  }
   0xc   : > { %1614 = sst [smem:[#allocation16_spill]] %s1242_s21  ;;  %s32_s23 = sadd.s32 1, %s1238_s20 }
   0xd   : > { %1615 = sst [smem:[#allocation17_spill]] %s1306_s22  ;;  %s29_s24 = ssub.s32 %s1242_s21, %s1306_s22 }
   0xe   : > { %p1599_p0 = scmp.ne.s32.totalorder %s1238_s20, %s1234_s19  ;;  %p30_p1 = scmp.eq.s32.totalorder %s29_s24, 0 }
   0xf   : > { %p40_p2 = scmp.eq.s32.totalorder %s1242_s21, 0  ;;  %p1014_p4 = scmp.lt.s32.totalorder %s1242_s21, 2 }
  0x10   : > { %s1317_s25 = scalar_select %p30_p1, %s1238_s20, %s32_s23  }
  0x11   : > { %p41_p5 = por %p40_p2, %p1599_p0  ;;  %s1600_s26 = sand.u32 1, %s1238_s20  }
  0x12   : > { %1616 = sst [smem:[#allocation18_spill]] %s1317_s25  ;;  %s1325_s27 = sshll.u32 %s1600_s26, 3 }
  0x13   : > { %s1328_s28 = sshll.u32 %s1242_s21, 7  ;;  %p1330_p6 = pnand %p1014_p4, %p41_p5 }
  0x14   : > { %s223_s30 = sand.u32 1, %s1242_s21   ;;  %s1618_s1 = sld [smem:[#allocation20_spill]] }
  0x15   : > { %s227_s9 = scalar_lea.vmem [#allocation5], %s1325_s27  ;;  %s1342_s11 = scalar_lea.sflag [#allocation6], %s223_s30 }
  0x16   : > { %s234_s10 = sshll.u32 %s227_s9, 4  ;;  %p1348_p8 = pneg %p1330_p6  ;;  %s235_s10 = int_to_ptr.vmem [resolvable:$true] %s234_s10 }
  0x1a   : > { %s1339_s8 = scalar_lea.hbm %s1618_s1, %s1328_s28  ;;  %s1065_s16 = scalar_lea.hbm %s1618_s1, 256 }
  0x1b   : > { %s1060_s12 = scalar_lea.hbm %s1339_s8, 128  ;;  %p1066_p11 = scmp.lt.s32.totalorder %s1339_s8, %s1618_s1 }
  0x1c   : > { %p1061_p7 = scmp.ne.s32.totalorder %s1339_s8, %s1060_s12  ;;  %p1067_p12 = scmp.lt.s32.totalorder %s1065_s16, %s1060_s12 }
  0x1e   : > { %p1063_p9 = pnand %p1348_p8, %p1061_p7  ;;  %p1068_p13 = por %p1067_p12, %p1066_p11 }
  0x20   : > { %p1064_p10 = pneg %p1063_p9 }
  0x22   : > { %p1069_p1 = pnand %p1068_p13, %p1064_p10 }
  0x24   : > { %1072 = shalt.err (!%p1069_p1)
}
  0x25   : > { %s1073_s24 = scalar_lea.vmem %s235_s10, 128  ;;  %s1244_s30 = smov [#allocation5]  }
  0x26   : > { %p1074_p2 = scmp.ne.s32.totalorder %s235_s10, %s1073_s24  ;;  %s1078_s6 = sshll.u32 %s1244_s30, 4  ;;  %s1079_s6 = int_to_ptr.vmem [resolvable:$false] %s1078_s6 }
  0x27   : > { %s1080_s7 = scalar_lea.vmem %s1079_s6, 256  ;;  %p1081_p7 = scmp.lt.s32.totalorder %s235_s10, %s1079_s6 }
  0x28   : > { %p1076_p4 = pnand %p1074_p2, %p1348_p8  ;;  %p1082_p9 = scmp.lt.s32.totalorder %s1080_s7, %s1073_s24 }
  0x2a   : > { %p1077_p5 = pneg %p1076_p4  ;;  %p1083_p3 = por %p1082_p9, %p1081_p7 }
  0x2c   : > { %p1084_p0 = pnand %p1083_p3, %p1077_p5 }
  0x2e   : > { %1087 = shalt.err (!%p1084_p0)
}
  0x2f   : > { %1005 = dma.hbm_to_vmem [thread:$0]  (!%p1330_p6), %s1339_s8, 128, %s235_s10, %s1342_s11  }
  0x30   : > { %s1368_s9 = sadd.s32 4294967295, %s1242_s21   ;;  %s894_s12 = sadd.s32 4294967294, %s1242_s21  }
  0x31   : > { %p45_p0 = scmp.ne.s32.totalorder %s1234_s19, %s1230_s18  ;;  %p1601_p3 = scmp.eq.s32.totalorder %s1368_s9, 0 }
  0x32   : > { %p163_p10 = scmp.eq.s32.totalorder %s1368_s9, 1  ;;  %p169_p11 = scmp.eq.s32.totalorder %s894_s12, 1 }
  0x33   : > { %p1377_p12 = por %p1601_p3, %p45_p0  ;;  %p895_p13 = scmp.ge.s32.totalorder %s1242_s21, 1 }
  0x34   : > { %p1621_p1 = scmp.ne.s32.totalorder %s1238_s20, %s1234_s19  ;;  %p1389_p4 = por %p169_p11, %p45_p0 }
  0x35   : > { %s1620_s14 = scalar_select %p1377_p12, 1, 0 }
  0x36   : > { %p1385_p2 = por %p163_p10, %p1621_p1  ;;  %p176_p5 = scmp.lt.s32.totalorder %s1242_s21, 3 }
  0x37   : > { %s1623_s10 = scalar_select %p1389_p4, 1, 0 }
  0x38   : > { %s1622_s8 = scalar_select %p1385_p2, 1, 0 }
  0x39   : > { %1624 = sst [smem:[#allocation19_spill]] %s1623_s10  ;;  %p1394_p7 = pnand %p895_p13, %p176_p5 }
  0x3a   : > { %s1245_s16 = smov [#allocation8]   ;;  %s1404_s30 = scalar_lea.hbm %s1593_s0, %s1328_s28 }
  0x3b   : > { %s1625_s15 = scalar_select %p1394_p7, 1, 0 }
  0x3c   : > { %s188_s17 = sshll.u32 %s1245_s16, 4  ;;  %p995_p9 = pneg %p1394_p7  ;;  %s189_s17 = int_to_ptr.vmem [resolvable:$true] %s188_s17 }
  0x3d   : > { %s209_s7 = scalar_lea.vmem [#allocation2], %s1325_s27  ;;  %s1419_s1 = scalar_lea.hbm %s1595_s2, %s1328_s28 }
  0x3e   : > { %p1408_p0 = pnand %p995_p9, %p1601_p3  ;;  %s216_s12 = sshll.u32 %s209_s7, 4  ;;  %s1413_s12 = int_to_ptr.vmem [resolvable:$true] %s216_s12 }
  0x3f   : > { %s1099_s23 = scalar_lea.vmem %s189_s17, 512  ;;  %p1107_p5 = scmp.lt.s32.totalorder %s189_s17, %s189_s17 }
  0x40   : > { %p1090_p10 = pneg %p1408_p0  ;;  %p1100_p11 = scmp.ne.s32.totalorder %s189_s17, %s1099_s23 }
  0x41   : > { %p1108_p9 = scmp.lt.s32.totalorder %s1099_s23, %s1099_s23 }
  0x42   : > { %p1102_p13 = pnand %p1100_p11, %p1090_p10 }
  0x43   : > { %p1109_p3 = por %p1108_p9, %p1107_p5 }
  0x44   : > { %p1103_p1 = pneg %p1102_p13 }
  0x46   : > { %p1110_p4 = pnand %p1109_p3, %p1103_p1 }
  0x48   : > { %1113 = shalt.err (!%p1110_p4)
}
  0x49   : > { %s1246_s24 = smov 128   ;;  %s1247_s26 = smov 8  }
  0x4a   : > { %998 = dma.hbm_to_vmem [thread:$0]  (!%p1408_p0), %s1596_s3, 512, %s189_s17, [#allocation9], %s1246_s24, %s1246_s24, %s1247_s26  }
  0x4b   : > { %s1627_s16 = sand.u32 1, %s1238_s20   ;;  %s1114_s22 = scalar_lea.hbm %s1404_s30, 128 }
  0x4c   : > { %s206_s25 = scalar_lea.sflag [#allocation3], %s1627_s16  ;;  %p1115_p10 = scmp.ne.s32.totalorder %s1404_s30, %s1114_s22 }
  0x4d   : > { %s1119_s10 = scalar_lea.hbm %s1593_s0, 256  ;;  %p1120_p11 = scmp.lt.s32.totalorder %s1404_s30, %s1593_s0 }
  0x4e   : > { %p1117_p3 = pnand %p1115_p10, %p1348_p8  ;;  %p1121_p13 = scmp.lt.s32.totalorder %s1119_s10, %s1114_s22 }
  0x50   : > { %p1118_p4 = pneg %p1117_p3  ;;  %p1122_p1 = por %p1121_p13, %p1120_p11 }
  0x52   : > { %p1123_p5 = pnand %p1122_p1, %p1118_p4 }
  0x54   : > { %1126 = shalt.err (!%p1123_p5)
}
  0x55   : > { %s1127_s17 = scalar_lea.vmem %s1413_s12, 128  ;;  %s1248_s6 = smov [#allocation2]  }
  0x56   : > { %p1128_p0 = scmp.ne.s32.totalorder %s1413_s12, %s1127_s17  ;;  %s1132_s21 = sshll.u32 %s1248_s6, 4  ;;  %s1133_s21 = int_to_ptr.vmem [resolvable:$false] %s1132_s21 }
  0x57   : > { %s1134_s24 = scalar_lea.vmem %s1133_s21, 256  ;;  %p1135_p3 = scmp.lt.s32.totalorder %s1413_s12, %s1133_s21 }
  0x58   : > { %p1130_p9 = pnand %p1128_p0, %p1348_p8  ;;  %p1136_p2 = scmp.lt.s32.totalorder %s1134_s24, %s1127_s17 }
  0x5a   : > { %p1131_p10 = pneg %p1130_p9  ;;  %p1137_p12 = por %p1136_p2, %p1135_p3 }
  0x5c   : > { %p1138_p7 = pnand %p1137_p12, %p1131_p10 }
  0x5e   : > { %1141 = shalt.err (!%p1138_p7)
}
  0x5f   : > { %1002 = dma.hbm_to_vmem [thread:$0]  (!%p1330_p6), %s1404_s30, 128, %s1413_s12, %s206_s25  }
  0x60   : > { %s245_s5 = scalar_lea.vmem [#allocation7], %s1325_s27  ;;  %s1142_s22 = scalar_lea.hbm %s1419_s1, 128 }
  0x61   : > { %s252_s18 = sshll.u32 %s245_s5, 4  ;;  %p1143_p4 = scmp.ne.s32.totalorder %s1419_s1, %s1142_s22  ;;  %s253_s18 = int_to_ptr.vmem [resolvable:$true] %s252_s18 }
  0x62   : > { %s1147_s28 = scalar_lea.hbm %s1595_s2, 256  ;;  %p1148_p12 = scmp.lt.s32.totalorder %s1419_s1, %s1595_s2 }
  0x63   : > { %p1145_p11 = pnand %p1143_p4, %p1348_p8  ;;  %p1149_p7 = scmp.lt.s32.totalorder %s1147_s28, %s1142_s22 }
  0x65   : > { %p1146_p2 = pneg %p1145_p11  ;;  %p1150_p13 = por %p1149_p7, %p1148_p12 }
  0x67   : > { %p1151_p1 = pnand %p1150_p13, %p1146_p2 }
  0x69   : > { %1154 = shalt.err (!%p1151_p1)
}
  0x6a   : > { %s1155_s25 = scalar_lea.vmem %s253_s18, 128  ;;  %s1249_s27 = smov [#allocation7]  }
  0x6b   : > { %p1156_p5 = scmp.ne.s32.totalorder %s253_s18, %s1155_s25  ;;  %s1160_s30 = sshll.u32 %s1249_s27, 4  ;;  %s1161_s30 = int_to_ptr.vmem [resolvable:$false] %s1160_s30 }
  0x6c   : > { %s1162_s12 = scalar_lea.vmem %s1161_s30, 256  ;;  %p1163_p10 = scmp.lt.s32.totalorder %s253_s18, %s1161_s30 }
  0x6d   : > { %p1158_p0 = pnand %p1156_p5, %p1348_p8  ;;  %p1164_p3 = scmp.lt.s32.totalorder %s1162_s12, %s1155_s25 }
  0x6f   : > { %p1159_p9 = pneg %p1158_p0  ;;  %p1165_p4 = por %p1164_p3, %p1163_p10 }
  0x71   : > { %p1166_p11 = pnand %p1165_p4, %p1159_p9 }
  0x73   : > { %1169 = shalt.err (!%p1166_p11)
}
  0x74   : > { %1008 = dma.hbm_to_vmem [thread:$0]  (!%p1330_p6), %s1419_s1, 128, %s253_s18, %s1342_s11  }
  0x75   : > { %p1628_p2 = scmp.ne.s32.totalorder %s1625_s15, 0 }
  0x76   : > { %s1471_s13 = sand.u32 (!%p1628_p2), 1, %s1234_s19   ;;  %p1629_p8 = scmp.ne.s32.totalorder (!%p1628_p2), %s1620_s14, 0 }
  0x77   : > { %261 = sbr.rel (%p1628_p2) target bundleno = 1170 (0x492), region = 40  ;;  %s1474_s23 = sshll.u32 (!%p1628_p2), %s1471_s13, 3 }
  0x78   : > { %s264_s17 = scalar_lea.sflag (!%p1628_p2), [#allocation3], %s1471_s13  ;;  %s267_s6 = scalar_lea.vmem (!%p1628_p2), [#allocation2], %s1474_s23 }
  0x7c   : > { %1213 = dma.done.wait (%p1629_p8), %s264_s17, 128  }
  0x7d   : > { %1215 = vsyncadd (%p1629_p8), %s264_s17, 4294967168  ;;  %s272_s1 = sand.u32 1, %s1368_s9   ;;  %s276_s11 = scalar_lea.vmem [#allocation5], %s1474_s23 }
  0x7e   : > { %s273_s29 = scalar_lea.sflag [#allocation6], %s272_s1 }
  0x7f   : > { %1217 = dma.done.wait (%p1629_p8), %s273_s29, 256  }
  0x80   : > { %1219 = vsyncadd (%p1629_p8), %s273_s29, 4294967040  ;;  %s285_s15 = scalar_lea.vmem [#allocation7], %s1474_s23  ;;  %p1630_p6 = scmp.eq.s32.totalorder %s1368_s9, 0 }
  0x82   : > { %1221 = dma.done.wait (%p1630_p6), [#allocation9], 512   ;;  %p1631_p12 = pmov %p1630_p6 }
  0x83   : > { %v1250_v0 = vmov 0.0   ;;  %vm1251_vm0 = vmmov 0   ;;  %v330_v1 = vld [vmem:[#allocation8 + $0x18] sm:$0xff]  ;;  %v328_v2 = vld [vmem:[#allocation8 + $0x8] sm:$0xff]  ;;  %s1252_s14 = smov 96   ;;  %v329_v3 = vld [vmem:[#allocation8 + $0x10] sm:$0xff] }
  0x84   : > { %1223 = vsyncadd (%p1631_p12), [#allocation9], 4294966784  ;;  %951 = vmatprep.subr.mxu1 %v1250_v0  ;;  %940 = vmatprep.subr.mxu0 %v1250_v0  ;;  %v327_v4 = vld [vmem:[#allocation8] sm:$0xff]  ;;  %v1504_v5 = vld [vmem:[%s1597_s4] ss:$0 sm:$0xff]  ;;  %vm338_vm1 = vcmask 261120  }
  0x85   : > { %959 = vmatprep.mubr.msk.f32.mxu1 %vm1251_vm0, %v1250_v0  ;;  %948 = vmatprep.mubr.msk.f32.mxu0 %vm1251_vm0, %v1250_v0  ;;  %v326_v6 = vld [vmem:[%s267_s6] sm:$0xff]  ;;  %v412_v11 = vld [vmem:[%s276_s11] sm:$0xff]  ;;  %s1253_s5 = smov 64   ;;  %vm671_vm2 = vcmask 64512   ;;  %s918_s18 = sshll.u32 %s1368_s9, 7 }
  0x86   : > { %423 = vrot.lane.b32.xlu0 %v330_v1, %s1252_s14  ;;  %419 = vrot.lane.b32.xlu1 %v328_v2, %s1252_s14  ;;  %v505_v23 = vld [vmem:[%s285_s15] sm:$0xff]  ;;  %s325_s22 = scalar_lea.vmem [#allocation10], %s1474_s23  ;;  %s1632_s7 = sld [smem:[#allocation21_spill]] }
  0x87   : > { %941 = vmatpush3.msra.mxu0 %v330_v1  ;;  %s771_s10 = sshll.u32 %s325_s22, 4  ;;  %s758_s25 = scalar_lea.sflag [#allocation4], %s1471_s13  ;;  %s1551_s10 = int_to_ptr.vmem [resolvable:$true] %s771_s10 }
  0x88   : > { %942 = vmatprep.subr.mxu0 %v1250_v0  ;;  %s1170_s27 = scalar_lea.vmem %s1551_s10, 128  ;;  %p1633_p13 = scmp.ne.s32.totalorder %s1622_s8, 0 }
  0x89   : > { %943 = vmatpush3.msra.mxu0 %v329_v3  ;;  %p1171_p7 = scmp.ne.s32.totalorder %s1551_s10, %s1170_s27  ;;  %s1254_s9 = smov [#allocation10]  }
  0x8a   : > { %421 = vrot.lane.b32.xlu0 %v329_v3, %s1252_s14  ;;  %417 = vrot.lane.b32.xlu1 %v327_v4, %s1252_s14  ;;  %s1174_s30 = sshll.u32 %s1254_s9, 4  ;;  %s1175_s30 = int_to_ptr.vmem [resolvable:$false] %s1174_s30 }
  0x8b   : > { %944 = vmatprep.subr.mxu0 %v1250_v0  ;;  %p1172_p1 = pnand %p1171_p7, %p1633_p13  ;;  %s1176_s12 = scalar_lea.vmem %s1175_s30, 256 }
  0x8c   : > { %945 = vmatpush3.msra.mxu0 %v328_v2  ;;  %s1549_s16 = scalar_lea.hbm %s1632_s7, %s918_s18  ;;  %p1177_p0 = scmp.lt.s32.totalorder %s1551_s10, %s1175_s30 }
  0x8d   : > { %946 = vmatprep.subr.mxu0 %v1250_v0  ;;  %p1173_p5 = pneg %p1172_p1  ;;  %p1178_p9 = scmp.lt.s32.totalorder %s1176_s12, %s1170_s27 }
  0x8e   : > { %947 = vmatpush3.msra.mxu0 %v327_v4  ;;  %429 = vrot.lane.b32.xlu0 %v1504_v5, %s1252_s14 }
  0x8f   : > { %949 = vmatmul.mubr.msk.f32.vlgmr.msra.gmra.mxu0 %vm338_vm1, %v326_v6  ;;  %962 = vmatprep.subr.mxu0 %v1250_v0  ;;  %p1179_p10 = por %p1178_p9, %p1177_p0 }
  0x90   : > { %970 = vmatprep.mubr.msk.f32.mxu0 %vm1251_vm0, %v1250_v0  ;;  %512 = vrot.lane.b32.xlu1 %v330_v1, %s1253_s5 }
  0x91   : > { %p1180_p3 = pnand %p1179_p10, %p1173_p5 }
  0x92   : > { %510 = vrot.lane.b32.xlu0 %v329_v3, %s1253_s5 }
  0x94   : > { %508 = vrot.lane.b32.xlu1 %v328_v2, %s1253_s5 }
  0x96   : > { %506 = vrot.lane.b32.xlu0 %v327_v4, %s1253_s5 }
  0xf8   : > { %v424_v7 = vpop.permute.xlu0 %423  ;;  %v420_v8 = vpop.permute.xlu1 %419 }
  0xf9   : > { %952 = vmatpush3.msra.mxu1 %v424_v7 }
  0xfa   : > { %953 = vmatprep.subr.mxu1 %v1250_v0 }
  0xfc   : > { %v422_v9 = vpop.permute.xlu0 %421  ;;  %v418_v10 = vpop.permute.xlu1 %417 }
  0xfd   : > { %954 = vmatpush3.msra.mxu1 %v422_v9 }
  0xfe   : > { %955 = vmatprep.subr.mxu1 %v1250_v0 }
  0xff   : > { %956 = vmatpush3.msra.mxu1 %v420_v8 }
 0x100   : > { %957 = vmatprep.subr.mxu1 %v1250_v0  ;;  %v430_v14 = vpop.permute.xlu0 %429 }
 0x101   : > { %958 = vmatpush3.msra.mxu1 %v418_v10 }
 0x102   : > { %960 = vmatmul.mubr.msk.f32.vlgmr.msra.gmra.mxu1 %vm338_vm1, %v412_v11  ;;  %973 = vmatprep.subr.mxu1 %v1250_v0  ;;  %v513_v19 = vpop.permute.xlu1 %512 }
 0x103   : > { %975 = vmatprep.mubr.msk.f32.mxu1 %vm1251_vm0, %v1250_v0  ;;  %963 = vmatpush3.msra.mxu0 %v513_v19 }
 0x104   : > { %v511_v20 = vpop.permute.xlu0 %510  ;;  %964 = vmatprep.subr.mxu0 %v1250_v0 }
 0x105   : > { %965 = vmatpush3.msra.mxu0 %v511_v20 }
 0x106   : > { %v509_v21 = vpop.permute.xlu1 %508  ;;  %966 = vmatprep.subr.mxu0 %v1250_v0 }
 0x107   : > { %967 = vmatpush3.msra.mxu0 %v509_v21 }
 0x108   : > { %v507_v22 = vpop.permute.xlu0 %506  ;;  %968 = vmatprep.subr.mxu0 %v1250_v0 }
 0x109   : > { %969 = vmatpush3.msra.mxu0 %v507_v22 }
 0x10a   : > { %971 = vmatmul.mubr.msk.f32.vlgmr.msra.gmra.mxu0 %vm338_vm1, %v505_v23 }
 0x14f   : > { %v408_v12 = vpop.f32.mrf.mxu0 }
 0x150   : > { %v409_v17 = vadd.f32 %v1504_v5, %v408_v12 }
 0x151   : > { %v950_v13 = vpop.f32.mrf.mxu0 }
 0x1c2   : > { %v501_v15 = vpop.f32.mrf.mxu1 }
 0x1c3   : > { %v502_v16 = vadd.f32 %v501_v15, %v430_v14 }
 0x1c4   : > { %v961_v18 = vpop.f32.mrf.mxu1 }
 0x1c5   : > { %974 = vmatpush3.xpose.msk.msra.mxu1 %vm338_vm1, %v502_v16 }
 0x1c6   : > { %978 = vmatprep.subr.mxu1 %v1250_v0 }
 0x1c8   : > { %976 = vmatmul.mubr.msk.f32.vlgmr.msra.gmra.mxu1 %vm338_vm1, %v409_v17 }
 0x1c9   : > { %980 = vmatprep.mubr.msk.f32.mxu1 %vm1251_vm0, %v1250_v0 }
 0x1ca   : > { %v590_v33 = vpop.f32.mrf.mxu0 }
 0x1cc   : > { %v972_v34 = vpop.f32.mrf.mxu0 }
 0x288   : > { %v666_v24 = vpop.f32.mrf.mxu1 }
 0x289   : > { %v670_v25 = vmul.f32 0.17677669, %v666_v24 }
 0x28a   : > { %v977_v26 = vpop.f32.mrf.mxu1 }
 0x28b   : > { %v672_v27 = vsel %vm671_vm2, %v670_v25, -inf }
 0x28c   : > { %673 = vmax.xlane.f32.xlu1 %v672_v27 }
 0x315   : > { %v674_v28 = vpop.xlane.xlu1 %673 }
 0x316   : > { %v675_v29 = vsub.f32 %v670_v25, %v674_v28 }
 0x318   : > { %v676_v30 = vmul.f32 1.442695, %v675_v29 }
 0x31a   : > { %1056 = vpow2.f32 %v676_v30 }
 0x327   : > { %v1057_v31 = vpop.eup %1056 }
 0x328   : > { %v678_v32 = vsel %vm671_vm2, %v1057_v31, 0.0 }
 0x329   : > { %679 = vadd.xlane.f32.xlu0 %v678_v32 }
 0x33f   : > { %518 = vrot.lane.b32.xlu0 %v1504_v5, %s1253_s5 }
 0x3b2   : > { %v680_v35 = vpop.xlane.xlu0 %679 }
 0x3b3   : > { %1058 = vrcp.f32 %v680_v35 }
 0x3b6   : > { %v519_v36 = vpop.permute.xlu0 %518 }
 0x3b7   : > { %v591_v37 = vadd.f32 %v590_v33, %v519_v36 }
 0x3b9   : > { %979 = vmatpush3.msra.mxu1 %v591_v37 }
 0x3c0   : > { %v1059_v38 = vpop.eup %1058 }
 0x3c1   : > { %v682_v39 = vmul.f32 %v1059_v38, %v1057_v31 }
 0x3c3   : > { %981 = vmatmul.mubr.msk.f32.vlgmr.msra.gmra.mxu1 %vm671_vm2, %v682_v39 }
 0x483   : > { %v752_v40 = vpop.f32.mrf.mxu1 }
 0x484   : > { %756 = vst.msk [vmem:[%s325_s22] sm:$0xff] %vm338_vm1, %v752_v40 }
 0x485   : > { %v982_v41 = vpop.f32.mrf.mxu1 }
 0x486   : > { %1183 = shalt.err (!%p1180_p3)
}
 0x487   : > { %s1184_s23 = scalar_lea.hbm %s1549_s16, 128  ;;  %s1188_s6 = scalar_lea.hbm %s1632_s7, 256 }
 0x488   : > { %p1185_p4 = scmp.ne.s32.totalorder %s1549_s16, %s1184_s23  ;;  %p1189_p8 = scmp.lt.s32.totalorder %s1549_s16, %s1632_s7 }
 0x489   : > { %p1190_p6 = scmp.lt.s32.totalorder %s1188_s6, %s1184_s23 }
 0x48a   : > { %p1186_p11 = pnand %p1185_p4, %p1633_p13 }
 0x48b   : > { %p1191_p12 = por %p1190_p6, %p1189_p8 }
 0x48c   : > { %p1187_p2 = pneg %p1186_p11 }
 0x48e   : > { %p1192_p7 = pnand %p1191_p12, %p1187_p2 }
 0x490   : > { %1195 = shalt.err (!%p1192_p7)
}
 0x491   : > { %993 = dma.vmem_to_hbm [thread:$0]  (%p1633_p13), %s1551_s10, 128, %s1549_s16, %s758_s25  }
 0x492 PF: > { %s1634_s11 = sld [smem:[#allocation15_spill]] }
 0x493   : > { %s1635_s15 = sld [smem:[#allocation19_spill]] }
 0x494   : > { %s1636_s14 = sld [smem:[#allocation16_spill]] }
 0x498   : > { %s783_s21 = sand.u32 1, %s1634_s11  }
 0x499   : > { %p1637_p1 = scmp.ne.s32.totalorder %s1635_s15, 0  ;;  %s784_s24 = scalar_lea.sflag [#allocation4], %s783_s21 }
 0x49a   : > { %p1638_p5 = scmp.ge.s32.totalorder %s1636_s14, 2 }
 0x49c   : > { %p1010_p0 = pnand %p1638_p5, %p1637_p1 }
 0x49e   : > { %p1011_p9 = pneg %p1010_p0 }
 0x4a0   : > { %1225 = dma.done.wait (%p1011_p9), %s784_s24, 128  }
 0x4a1   : > { %1227 = vsyncadd (%p1011_p9), %s784_s24, 4294967168  ;;  %s1639_s21 = sld [smem:[#allocation17_spill]]  ;;  %s1641_s18 = smov %s1234_s19 }
 0x4a2   : > { %s1640_s5 = sld [smem:[#allocation18_spill]]  ;;  %s1642_s19 = smov %s1238_s20 }
 0x4a7   : > { %p22_p10 = scmp.ge.s32.totalorder %s1639_s21, 4  }
 0x4a8   : > { %s1643_s20 = smov %s1640_s5 }
 0x4a9   :  { %24 = sbr.rel (!%p22_p10) target bundleno = 11 (0xb), region = 113 }
 0x4ae   :  { %789 = vsyncpa [#allocation3], 1 }
 0x4af   :  { %791 = vsyncpa [#allocation3 + $0x1], 1 }
 0x4b0   :  { %792 = vsyncpa [#allocation6], 1 }
 0x4b1   :  { %794 = vsyncpa [#allocation6 + $0x1], 1 }
 0x4b2   :  { %795 = vsyncpa [#allocation9], 1 }
 0x4b3   :  { %796 = vsyncpa [#allocation4], 1 }
 0x4b4   :  { %798 = vsyncpa [#allocation4 + $0x1], 1 }

</bundles_post_ra>
